<compile_context>
chip_gen: v6e
topology: v6e:2x2x1
jax: 0.10.0
libtpu: 0.0.40
codegen_flags: <defaults>
</compile_context>

<pallas_src>
import functools

import jax
import jax.numpy as jnp
from jax.experimental import pallas as pl
from jax.experimental.pallas import tpu as pltpu

LN_EPS = 1e-5


def _round_up(n, m):
    return ((n + m - 1) // m) * m


def _vmem_capacity_bytes():
    """Physical VMEM per TensorCore; falls back to 128 MiB if the query fails."""
    try:
        return int(pltpu.get_tpu_info().vmem_capacity_bytes)
    except Exception:
        return 128 << 20


def _pick_tile_m(N, vmem_cap):
    """Row tile: big enough to amortize the ~0.35us/step pipeline overhead,
    capped by per-chip VMEM, and clamped so the grid has >= 2 steps (v7x 2 TCs)."""
    cap_rows = 1024 if vmem_cap >= (100 << 20) else 512   # v5e/v6e vs v7x
    tm = min(cap_rows, _round_up(N, 8))
    if N > 8:
        # ensure n_pad // tm >= 2 so both v7x TensorCores get work
        tm = min(tm, _round_up(pl.cdiv(_round_up(N, 8), 2), 8))
    return max(tm, 8)


def _vmem_limit_bytes(tm, d_embed, d_hidden, x_itemsize, out_itemsize,
                      param_bytes, vmem_cap):
    """Actual buffer need + headroom; never claim all of a v7x TC's 64 MiB."""
    act_in = 2 * tm * d_embed * x_itemsize       # double-buffered input tiles
    act_out = 2 * tm * d_embed * out_itemsize    # double-buffered output tiles
    # compiler-materialized temporaries: f32 pre-cast output, bf16 cast copy of x,
    # a handful of (tm, d_hidden) f32 LN/ReLU temps
    interm = tm * d_embed * 4 + tm * d_embed * 2 + 4 * tm * d_hidden * 4
    need = act_in + act_out + param_bytes + interm
    limit = int(need * 1.5) + (4 << 20)
    limit = max(limit, 16 << 20)                 # floor for Mosaic internal scratch
    limit = min(limit, vmem_cap - (8 << 20))     # leave physical headroom
    return limit


def _layernorm(h, gamma, beta):
    """LayerNorm over last dim, one-pass stats + folded scale/shift (f32)."""
    mu = jnp.mean(h, axis=-1, keepdims=True)
    ms = jnp.mean(h * h, axis=-1, keepdims=True)
    rstd = jax.lax.rsqrt(ms - mu * mu + LN_EPS)
    scale = rstd * gamma                 # (tm,1) * (1,dh)
    shift = beta - mu * scale            # (1,dh) - (tm,1) * (tm,dh)
    return h * scale + shift             # 1 mul + 1 add per element


def mlp_text_kernel(
    x_ref,
    w1_ref, b1_ref, g1_ref, be1_ref,
    w2_ref, b2_ref, g2_ref, be2_ref,
    w3_ref, b3_ref,
    o_ref,
):
    # bf16 MXU operands, f32 accumulate.  If x is already bf16 the cast is a no-op.
    x = x_ref[...].astype(jnp.bfloat16)

    # ---- Linear(d_embed -> d_hidden) + ReLU + (Dropout=id) + LayerNorm ----
    h = jnp.dot(x, w1_ref[...], preferred_element_type=jnp.float32) + b1_ref[...]
    h = jnp.maximum(h, 0.0)
    h = _layernorm(h, g1_ref[...], be1_ref[...])

    # ---- Linear(d_hidden -> d_hidden) + ReLU + (Dropout=id) + LayerNorm ----
    h = jnp.dot(h.astype(jnp.bfloat16), w2_ref[...],
                preferred_element_type=jnp.float32) + b2_ref[...]
    h = jnp.maximum(h, 0.0)
    h = _layernorm(h, g2_ref[...], be2_ref[...])

    # ---- Linear(d_hidden -> d_embed) + ReLU ----
    h = jnp.dot(h.astype(jnp.bfloat16), w3_ref[...],
                preferred_element_type=jnp.float32) + b3_ref[...]
    h = jnp.maximum(h, 0.0)

    # TODO(synk): training-mode Dropout (pltpu.prng_seed + prng_random_bits masking)
    # is not implemented; kernel uses inference semantics (identity).
    o_ref[...] = h.astype(o_ref.dtype)


@functools.partial(jax.jit, static_argnames=("tm", "vmem_limit", "out_dtype"))
def _mlp_text_call(x, params, *, tm, vmem_limit, out_dtype):
    N, d_embed = x.shape
    d_hidden = params["w1"].shape[1]

    n_pad = _round_up(N, tm)
    if n_pad != N:
        x = jnp.pad(x, ((0, n_pad - N), (0, 0)))

    rows = lambda i: (i, 0)          # activations: tiled over rows
    const = lambda i: (0, 0)         # parameters: one resident block

    def resident(shape):
        # Constant index_map => single-buffer (double-buffering would just
        # duplicate every resident parameter in VMEM).
        return pl.BlockSpec(shape, const, pipeline_mode=pl.Buffered(1))

    in_specs = [
        pl.BlockSpec((tm, d_embed), rows),        # x (default double-buffered)
        resident((d_embed, d_hidden)),            # w1 (bf16)
        resident((1, d_hidden)),                  # b1
        resident((1, d_hidden)),                  # gamma1
        resident((1, d_hidden)),                  # beta1
        resident((d_hidden, d_hidden)),           # w2 (bf16)
        resident((1, d_hidden)),                  # b2
        resident((1, d_hidden)),                  # gamma2
        resident((1, d_hidden)),                  # beta2
        resident((d_hidden, d_embed)),            # w3 (bf16)
        resident((1, d_embed)),                   # b3
    ]

    flops = 2 * n_pad * (d_embed * d_hidden + d_hidden * d_hidden + d_hidden * d_embed)
    param_bytes = sum(int(v.size) * v.dtype.itemsize for v in params.values())
    out_itemsize = jnp.dtype(out_dtype).itemsize
    bytes_accessed = (n_pad * d_embed * (x.dtype.itemsize + out_itemsize)
                      + param_bytes)

    out = pl.pallas_call(
        mlp_text_kernel,
        out_shape=jax.ShapeDtypeStruct((n_pad, d_embed), out_dtype),
        grid_spec=pltpu.PrefetchScalarGridSpec(
            num_scalar_prefetch=0,
            grid=(n_pad // tm,),
            in_specs=in_specs,
            out_specs=pl.BlockSpec((tm, d_embed), rows),
        ),
        compiler_params=pltpu.CompilerParams(
            dimension_semantics=("parallel",),
            vmem_limit_bytes=vmem_limit,
        ),
        cost_estimate=pl.CostEstimate(
            flops=flops,
            transcendentals=2 * n_pad,            # one rsqrt per row per LayerNorm
            bytes_accessed=bytes_accessed,
        ),
    )(
        x,
        params["w1"], params["b1"], params["g1"], params["be1"],
        params["w2"], params["b2"], params["g2"], params["be2"],
        params["w3"], params["b3"],
    )
    return out[:N] if n_pad != N else out


def mlp_text_forward(x, params, *, tile_m=None, out_dtype=None):
    """x: (N, d_embed) f32 or bf16. params: kernel-ready tensors (weights bf16).
    out_dtype=jnp.bfloat16 halves the HBM write stream if the consumer accepts it."""
    N, d_embed = x.shape
    d_hidden = params["w1"].shape[1]
    out_dtype = x.dtype if out_dtype is None else jnp.dtype(out_dtype)

    vmem_cap = _vmem_capacity_bytes()
    tm = _pick_tile_m(N, vmem_cap) if tile_m is None else max(8, _round_up(min(tile_m, _round_up(N, 8)), 8))

    param_bytes = sum(int(v.size) * v.dtype.itemsize for v in params.values())
    vmem_limit = _vmem_limit_bytes(tm, d_embed, d_hidden,
                                   x.dtype.itemsize, out_dtype.itemsize,
                                   param_bytes, vmem_cap)

    return _mlp_text_call(x, params, tm=int(tm), vmem_limit=int(vmem_limit),
                          out_dtype=out_dtype)


def init_params(key, d_embed):
    """Deterministic init matching PyTorch shapes. Weights stored (in,out), bf16."""
    d_hidden = d_embed // 4
    ks = jax.random.split(key, 6)

    def linear(kw, kb, fan_in, fan_out):
        bound = 1.0 / (fan_in ** 0.5)
        w = jax.random.uniform(kw, (fan_in, fan_out), jnp.float32, -bound, bound)
        b = jax.random.uniform(kb, (1, fan_out), jnp.float32, -bound, bound)
        return w.astype(jnp.bfloat16), b          # matmul operands bf16, bias f32

    w1, b1 = linear(ks[0], ks[1], d_embed, d_hidden)
    w2, b2 = linear(ks[2], ks[3], d_hidden, d_hidden)
    w3, b3 = linear(ks[4], ks[5], d_hidden, d_embed)

    return {
        "w1": w1, "b1": b1,
        "g1": jnp.ones((1, d_hidden), jnp.float32),
        "be1": jnp.zeros((1, d_hidden), jnp.float32),
        "w2": w2, "b2": b2,
        "g2": jnp.ones((1, d_hidden), jnp.float32),
        "be2": jnp.zeros((1, d_hidden), jnp.float32),
        "w3": w3, "b3": b3,
    }


def mlp_text_ref(x, p):
    """Pure-JAX reference (same bf16 matmul operands, f32 accumulate)."""
    def ln(h, g, b):
        mu = h.mean(-1, keepdims=True)
        var = ((h - mu) ** 2).mean(-1, keepdims=True)
        return (h - mu) * jax.lax.rsqrt(var + LN_EPS) * g + b

    def dot_bf16(a, w):
        return jnp.dot(a.astype(jnp.bfloat16), w.astype(jnp.bfloat16),
                       preferred_element_type=jnp.float32)

    h = jnp.maximum(dot_bf16(x, p["w1"]) + p["b1"], 0.0)
    h = ln(h, p["g1"], p["be1"])
    h = jnp.maximum(dot_bf16(h, p["w2"]) + p["b2"], 0.0)
    h = ln(h, p["g2"], p["be2"])
    return jnp.maximum(dot_bf16(h, p["w3"]) + p["b3"], 0.0)


if __name__ == "__main__":
    d_embed = 512            # small stand-in for 1024 (d_hidden = 128, lane-aligned)
    batch, seq = 2, 8
    key = jax.random.PRNGKey(0)
    kx, kp = jax.random.split(key)

    x3d = jax.random.normal(kx, (batch, seq, d_embed), jnp.float32)
    x = x3d.reshape(batch * seq, d_embed)   # flatten leading dims (plain JAX glue)

    params = init_params(kp, d_embed)

    out = mlp_text_forward(x, params)       # chip-aware tile, >=2 grid steps
    out = jax.block_until_ready(out)

    ref = mlp_text_ref(x, params)
    assert out.shape == (batch * seq, d_embed)
    assert out.dtype == x.dtype
    assert jnp.allclose(out, ref, atol=2e-2, rtol=2e-2), "mismatch vs reference"

    out3d = out.reshape(batch, seq, d_embed)  # module-shaped output
    print("KERNEL_OK")
</pallas_src>

<mosaic_0001>
module attributes {stable_mosaic.version = 11 : i64} {
  func.func @mlp_text_kernel(%arg0: i32, %arg1: memref<8x512xf32, #tpu.memory_space<vmem>>, %arg2: memref<512x128xbf16, #tpu.memory_space<vmem>>, %arg3: memref<1x128xf32, #tpu.memory_space<vmem>>, %arg4: memref<1x128xf32, #tpu.memory_space<vmem>>, %arg5: memref<1x128xf32, #tpu.memory_space<vmem>>, %arg6: memref<128x128xbf16, #tpu.memory_space<vmem>>, %arg7: memref<1x128xf32, #tpu.memory_space<vmem>>, %arg8: memref<1x128xf32, #tpu.memory_space<vmem>>, %arg9: memref<1x128xf32, #tpu.memory_space<vmem>>, %arg10: memref<128x512xbf16, #tpu.memory_space<vmem>>, %arg11: memref<1x512xf32, #tpu.memory_space<vmem>>, %arg12: memref<8x512xf32, #tpu.memory_space<vmem>>) attributes {dimension_semantics = [#tpu.dimension_semantics<parallel>], iteration_bounds = array<i64: 2>, scalar_prefetch = 0 : i64, scratch_operands = 0 : i64, tpu.core_type = #tpu.core_type<tc>, window_params = [{transform_indices = @transform_0, window_bounds = array<i64: 8, 512>}, {pipeline_mode = #tpu.pipeline_mode<synchronous>, transform_indices = @transform_1, window_bounds = array<i64: 512, 128>}, {pipeline_mode = #tpu.pipeline_mode<synchronous>, transform_indices = @transform_2, window_bounds = array<i64: 1, 128>}, {pipeline_mode = #tpu.pipeline_mode<synchronous>, transform_indices = @transform_3, window_bounds = array<i64: 1, 128>}, {pipeline_mode = #tpu.pipeline_mode<synchronous>, transform_indices = @transform_4, window_bounds = array<i64: 1, 128>}, {pipeline_mode = #tpu.pipeline_mode<synchronous>, transform_indices = @transform_5, window_bounds = array<i64: 128, 128>}, {pipeline_mode = #tpu.pipeline_mode<synchronous>, transform_indices = @transform_6, window_bounds = array<i64: 1, 128>}, {pipeline_mode = #tpu.pipeline_mode<synchronous>, transform_indices = @transform_7, window_bounds = array<i64: 1, 128>}, {pipeline_mode = #tpu.pipeline_mode<synchronous>, transform_indices = @transform_8, window_bounds = array<i64: 1, 128>}, {pipeline_mode = #tpu.pipeline_mode<synchronous>, transform_indices = @transform_9, window_bounds = array<i64: 128, 512>}, {pipeline_mode = #tpu.pipeline_mode<synchronous>, transform_indices = @transform_10, window_bounds = array<i64: 1, 512>}, {transform_indices = @transform_11, window_bounds = array<i64: 8, 512>}]} {
    %c0 = arith.constant 0 : index
    %c0_0 = arith.constant 0 : index
    %0 = vector.load %arg1[%c0, %c0_0] : memref<8x512xf32, #tpu.memory_space<vmem>>, vector<8x512xf32>
    %1 = arith.truncf %0 : vector<8x512xf32> to vector<8x512xbf16>
    %c0_1 = arith.constant 0 : index
    %c0_2 = arith.constant 0 : index
    %2 = vector.load %arg2[%c0_1, %c0_2] : memref<512x128xbf16, #tpu.memory_space<vmem>>, vector<512x128xbf16>
    %cst = arith.constant dense<0.000000e+00> : vector<8x128xf32>
    %3 = tpu.matmul %1, %2, %cst {dimension_numbers = #tpu.dot_dimension_numbers<[1], [0], [0], [1], [0, 0, 1, 1], [], []>} : vector<8x512xbf16>, vector<512x128xbf16>, vector<8x128xf32> -> vector<8x128xf32>
    %c0_3 = arith.constant 0 : index
    %c0_4 = arith.constant 0 : index
    %4 = vector.load %arg3[%c0_3, %c0_4] : memref<1x128xf32, #tpu.memory_space<vmem>>, vector<1x128xf32>
    %5 = vector.broadcast %4 : vector<1x128xf32> to vector<8x128xf32>
    %6 = arith.addf %3, %5 : vector<8x128xf32>
    %cst_5 = arith.constant 0.000000e+00 : f32
    %7 = vector.broadcast %cst_5 : f32 to vector<8x128xf32>
    %8 = arith.maximumf %6, %7 : vector<8x128xf32>
    %c0_6 = arith.constant 0 : index
    %c0_7 = arith.constant 0 : index
    %9 = vector.load %arg4[%c0_6, %c0_7] : memref<1x128xf32, #tpu.memory_space<vmem>>, vector<1x128xf32>
    %c0_8 = arith.constant 0 : index
    %c0_9 = arith.constant 0 : index
    %10 = vector.load %arg5[%c0_8, %c0_9] : memref<1x128xf32, #tpu.memory_space<vmem>>, vector<1x128xf32>
    %cst_10 = arith.constant dense<0.000000e+00> : vector<8xf32>
    %11 = vector.multi_reduction <add>, %8, %cst_10 [1] : vector<8x128xf32> to vector<8xf32>
    %12 = vector.shape_cast %11 : vector<8xf32> to vector<8x1xf32>
    %cst_11 = arith.constant 1.280000e+02 : f32
    %13 = vector.broadcast %cst_11 : f32 to vector<8x1xf32>
    %14 = arith.divf %12, %13 : vector<8x1xf32>
    %15 = arith.mulf %8, %8 : vector<8x128xf32>
    %cst_12 = arith.constant dense<0.000000e+00> : vector<8xf32>
    %16 = vector.multi_reduction <add>, %15, %cst_12 [1] : vector<8x128xf32> to vector<8xf32>
    %17 = vector.shape_cast %16 : vector<8xf32> to vector<8x1xf32>
    %cst_13 = arith.constant 1.280000e+02 : f32
    %18 = vector.broadcast %cst_13 : f32 to vector<8x1xf32>
    %19 = arith.divf %17, %18 : vector<8x1xf32>
    %20 = arith.mulf %14, %14 : vector<8x1xf32>
    %21 = arith.subf %19, %20 : vector<8x1xf32>
    %cst_14 = arith.constant 9.99999974E-6 : f32
    %22 = vector.broadcast %cst_14 : f32 to vector<8x1xf32>
    %23 = arith.addf %21, %22 : vector<8x1xf32>
    %24 = math.rsqrt %23 : vector<8x1xf32>
    %25 = vector.broadcast %24 : vector<8x1xf32> to vector<8x128xf32>
    %26 = vector.broadcast %9 : vector<1x128xf32> to vector<8x128xf32>
    %27 = arith.mulf %25, %26 : vector<8x128xf32>
    %28 = vector.broadcast %14 : vector<8x1xf32> to vector<8x128xf32>
    %29 = arith.mulf %28, %27 : vector<8x128xf32>
    %30 = vector.broadcast %10 : vector<1x128xf32> to vector<8x128xf32>
    %31 = arith.subf %30, %29 : vector<8x128xf32>
    %32 = arith.mulf %8, %27 : vector<8x128xf32>
    %33 = arith.addf %32, %31 : vector<8x128xf32>
    %34 = arith.truncf %33 : vector<8x128xf32> to vector<8x128xbf16>
    %c0_15 = arith.constant 0 : index
    %c0_16 = arith.constant 0 : index
    %35 = vector.load %arg6[%c0_15, %c0_16] : memref<128x128xbf16, #tpu.memory_space<vmem>>, vector<128x128xbf16>
    %cst_17 = arith.constant dense<0.000000e+00> : vector<8x128xf32>
    %36 = tpu.matmul %34, %35, %cst_17 {dimension_numbers = #tpu.dot_dimension_numbers<[1], [0], [0], [1], [0, 0, 1, 1], [], []>} : vector<8x128xbf16>, vector<128x128xbf16>, vector<8x128xf32> -> vector<8x128xf32>
    %c0_18 = arith.constant 0 : index
    %c0_19 = arith.constant 0 : index
    %37 = vector.load %arg7[%c0_18, %c0_19] : memref<1x128xf32, #tpu.memory_space<vmem>>, vector<1x128xf32>
    %38 = vector.broadcast %37 : vector<1x128xf32> to vector<8x128xf32>
    %39 = arith.addf %36, %38 : vector<8x128xf32>
    %cst_20 = arith.constant 0.000000e+00 : f32
    %40 = vector.broadcast %cst_20 : f32 to vector<8x128xf32>
    %41 = arith.maximumf %39, %40 : vector<8x128xf32>
    %c0_21 = arith.constant 0 : index
    %c0_22 = arith.constant 0 : index
    %42 = vector.load %arg8[%c0_21, %c0_22] : memref<1x128xf32, #tpu.memory_space<vmem>>, vector<1x128xf32>
    %c0_23 = arith.constant 0 : index
    %c0_24 = arith.constant 0 : index
    %43 = vector.load %arg9[%c0_23, %c0_24] : memref<1x128xf32, #tpu.memory_space<vmem>>, vector<1x128xf32>
    %cst_25 = arith.constant dense<0.000000e+00> : vector<8xf32>
    %44 = vector.multi_reduction <add>, %41, %cst_25 [1] : vector<8x128xf32> to vector<8xf32>
    %45 = vector.shape_cast %44 : vector<8xf32> to vector<8x1xf32>
    %cst_26 = arith.constant 1.280000e+02 : f32
    %46 = vector.broadcast %cst_26 : f32 to vector<8x1xf32>
    %47 = arith.divf %45, %46 : vector<8x1xf32>
    %48 = arith.mulf %41, %41 : vector<8x128xf32>
    %cst_27 = arith.constant dense<0.000000e+00> : vector<8xf32>
    %49 = vector.multi_reduction <add>, %48, %cst_27 [1] : vector<8x128xf32> to vector<8xf32>
    %50 = vector.shape_cast %49 : vector<8xf32> to vector<8x1xf32>
    %cst_28 = arith.constant 1.280000e+02 : f32
    %51 = vector.broadcast %cst_28 : f32 to vector<8x1xf32>
    %52 = arith.divf %50, %51 : vector<8x1xf32>
    %53 = arith.mulf %47, %47 : vector<8x1xf32>
    %54 = arith.subf %52, %53 : vector<8x1xf32>
    %cst_29 = arith.constant 9.99999974E-6 : f32
    %55 = vector.broadcast %cst_29 : f32 to vector<8x1xf32>
    %56 = arith.addf %54, %55 : vector<8x1xf32>
    %57 = math.rsqrt %56 : vector<8x1xf32>
    %58 = vector.broadcast %57 : vector<8x1xf32> to vector<8x128xf32>
    %59 = vector.broadcast %42 : vector<1x128xf32> to vector<8x128xf32>
    %60 = arith.mulf %58, %59 : vector<8x128xf32>
    %61 = vector.broadcast %47 : vector<8x1xf32> to vector<8x128xf32>
    %62 = arith.mulf %61, %60 : vector<8x128xf32>
    %63 = vector.broadcast %43 : vector<1x128xf32> to vector<8x128xf32>
    %64 = arith.subf %63, %62 : vector<8x128xf32>
    %65 = arith.mulf %41, %60 : vector<8x128xf32>
    %66 = arith.addf %65, %64 : vector<8x128xf32>
    %67 = arith.truncf %66 : vector<8x128xf32> to vector<8x128xbf16>
    %c0_30 = arith.constant 0 : index
    %c0_31 = arith.constant 0 : index
    %68 = vector.load %arg10[%c0_30, %c0_31] : memref<128x512xbf16, #tpu.memory_space<vmem>>, vector<128x512xbf16>
    %cst_32 = arith.constant dense<0.000000e+00> : vector<8x512xf32>
    %69 = tpu.matmul %67, %68, %cst_32 {dimension_numbers = #tpu.dot_dimension_numbers<[1], [0], [0], [1], [0, 0, 1, 1], [], []>} : vector<8x128xbf16>, vector<128x512xbf16>, vector<8x512xf32> -> vector<8x512xf32>
    %c0_33 = arith.constant 0 : index
    %c0_34 = arith.constant 0 : index
    %70 = vector.load %arg11[%c0_33, %c0_34] : memref<1x512xf32, #tpu.memory_space<vmem>>, vector<1x512xf32>
    %71 = vector.broadcast %70 : vector<1x512xf32> to vector<8x512xf32>
    %72 = arith.addf %69, %71 : vector<8x512xf32>
    %cst_35 = arith.constant 0.000000e+00 : f32
    %73 = vector.broadcast %cst_35 : f32 to vector<8x512xf32>
    %74 = arith.maximumf %72, %73 : vector<8x512xf32>
    %c0_36 = arith.constant 0 : index
    %c0_37 = arith.constant 0 : index
    %75 = vector.load %arg12[%c0_36, %c0_37] : memref<8x512xf32, #tpu.memory_space<vmem>>, vector<8x512xf32>
    tpu.vector_store %arg12[%c0_36, %c0_37], %74 {strides = array<i32>} : memref<8x512xf32, #tpu.memory_space<vmem>>, vector<8x512xf32>,
    return
  }
  func.func @transform_0(%arg0: i32) -> (i32, i32) {
    %c0_i32 = arith.constant 0 : i32
    %c0_i32_0 = arith.constant 0 : i32
    return %arg0, %c0_i32 : i32, i32
  }
  func.func @transform_1(%arg0: i32) -> (i32, i32) {
    %c0_i32 = arith.constant 0 : i32
    %c0_i32_0 = arith.constant 0 : i32
    %c0_i32_1 = arith.constant 0 : i32
    return %c0_i32, %c0_i32_0 : i32, i32
  }
  func.func @transform_2(%arg0: i32) -> (i32, i32) {
    %c0_i32 = arith.constant 0 : i32
    %c0_i32_0 = arith.constant 0 : i32
    %c0_i32_1 = arith.constant 0 : i32
    return %c0_i32, %c0_i32_0 : i32, i32
  }
  func.func @transform_3(%arg0: i32) -> (i32, i32) {
    %c0_i32 = arith.constant 0 : i32
    %c0_i32_0 = arith.constant 0 : i32
    %c0_i32_1 = arith.constant 0 : i32
    return %c0_i32, %c0_i32_0 : i32, i32
  }
  func.func @transform_4(%arg0: i32) -> (i32, i32) {
    %c0_i32 = arith.constant 0 : i32
    %c0_i32_0 = arith.constant 0 : i32
    %c0_i32_1 = arith.constant 0 : i32
    return %c0_i32, %c0_i32_0 : i32, i32
  }
  func.func @transform_5(%arg0: i32) -> (i32, i32) {
    %c0_i32 = arith.constant 0 : i32
    %c0_i32_0 = arith.constant 0 : i32
    %c0_i32_1 = arith.constant 0 : i32
    return %c0_i32, %c0_i32_0 : i32, i32
  }
  func.func @transform_6(%arg0: i32) -> (i32, i32) {
    %c0_i32 = arith.constant 0 : i32
    %c0_i32_0 = arith.constant 0 : i32
    %c0_i32_1 = arith.constant 0 : i32
    return %c0_i32, %c0_i32_0 : i32, i32
  }
  func.func @transform_7(%arg0: i32) -> (i32, i32) {
    %c0_i32 = arith.constant 0 : i32
    %c0_i32_0 = arith.constant 0 : i32
    %c0_i32_1 = arith.constant 0 : i32
    return %c0_i32, %c0_i32_0 : i32, i32
  }
  func.func @transform_8(%arg0: i32) -> (i32, i32) {
    %c0_i32 = arith.constant 0 : i32
    %c0_i32_0 = arith.constant 0 : i32
    %c0_i32_1 = arith.constant 0 : i32
    return %c0_i32, %c0_i32_0 : i32, i32
  }
  func.func @transform_9(%arg0: i32) -> (i32, i32) {
    %c0_i32 = arith.constant 0 : i32
    %c0_i32_0 = arith.constant 0 : i32
    %c0_i32_1 = arith.constant 0 : i32
    return %c0_i32, %c0_i32_0 : i32, i32
  }
  func.func @transform_10(%arg0: i32) -> (i32, i32) {
    %c0_i32 = arith.constant 0 : i32
    %c0_i32_0 = arith.constant 0 : i32
    %c0_i32_1 = arith.constant 0 : i32
    return %c0_i32, %c0_i32_0 : i32, i32
  }
  func.func @transform_11(%arg0: i32) -> (i32, i32) {
    %c0_i32 = arith.constant 0 : i32
    %c0_i32_0 = arith.constant 0 : i32
    return %arg0, %c0_i32 : i32, i32
  }
}

</mosaic_0001>

<bundles_post_ra>
// kernel: _mlp_text_call.1
= control target key start
LH: loop header
LB: loop body
LE: loop exit
PB: predicated region body
PF: predicated region fallthrough
CT: control target
= control target key end

     0   :  { %s2296_s0 = inlined_call_operand.hbm [shape: f32[16,512], index: 0, kind: input, shape index: {}]   ;;  %s2297_s1 = inlined_call_operand.hbm [shape: bf16[512,128], index: 1, kind: input, shape index: {}]   ;;  %s2298_s2 = inlined_call_operand.vmem [shape: f32[1,128], index: 2, kind: input, shape index: {}]   ;;  %s2299_s3 = inlined_call_operand.vmem [shape: f32[1,128], index: 3, kind: input, shape index: {}]   ;;  %s2300_s4 = inlined_call_operand.vmem [shape: f32[1,128], index: 4, kind: input, shape index: {}]   ;;  %s2301_s5 = inlined_call_operand.hbm [shape: bf16[128,128], index: 5, kind: input, shape index: {}]   ;;  %s2302_s6 = inlined_call_operand.hbm [shape: f32[1,128], index: 6, kind: input, shape index: {}]   ;;  %s2303_s7 = inlined_call_operand.vmem [shape: f32[1,128], index: 7, kind: input, shape index: {}]   ;;  %s2304_s8 = inlined_call_operand.vmem [shape: f32[1,128], index: 8, kind: input, shape index: {}]   ;;  %s2305_s9 = inlined_call_operand.hbm [shape: bf16[128,512], index: 9, kind: input, shape index: {}]   ;;  %s2306_s10 = inlined_call_operand.vmem [shape: f32[1,512], index: 10, kind: input, shape index: {}]   ;;  %s2307_s11 = inlined_call_operand.hbm [shape: f32[16,512], index: 11, kind: output, shape index: {}]  }
   0x1   :  { %2313 = sst [smem:[#allocation18_spill]] %s2297_s1 }
   0x2   :  { %2314 = sst [smem:[#allocation19_spill]] %s2301_s5 }
   0x3   :  { %2315 = sst [smem:[#allocation20_spill]] %s2302_s6 }
   0x4   :  { %2316 = sst [smem:[#allocation21_spill]] %s2305_s9 }
   0x5   :  { %16 = vsyncpa [#allocation3], 0 }
   0x6   :  { %18 = vsyncpa [#allocation3 + $0x1], 0 }
   0x7   :  { %19 = vsyncpa [#allocation6], 0 }
   0x8   :  { %20 = vsyncpa [#allocation9], 0 }
   0x9   :  { %21 = vsyncpa [#allocation4], 0 }
   0xa   :  { %23 = vsyncpa [#allocation4 + $0x1], 0  ;;  %s2054_s17 = smov 0   ;;  %s2056_s18 = smov 0  }
   0xb   :  { %s2058_s19 = smov 0   ;;  %s2060_s20 = smov 0  }
   0xc LB: > { %2317 = sst [smem:[#allocation16_spill]] %s1975_s19  ;;  %s1981_s21 = smov [#allocation5]   ;;  %s1979_s20 = sphi %s2060_s20, %s2343_s20   ;;  %s1975_s19 = sphi %s2058_s19, %s2340_s19   ;;  %s1971_s18 = sphi %s2056_s18, %s2342_s18   ;;  %s1967_s17 = sphi %s2054_s17, %s2341_s17  }
   0xd   : > { %s308_s22 = sshll.u32 %s1981_s21, 4  ;;  %s2075_s23 = sadd.s32 4294967295, %s1979_s20   ;;  %s309_s22 = int_to_ptr.vmem [resolvable:$true] %s308_s22 }
   0xe   : > { %p1415_p0 = scmp.ge.s32.totalorder %s1979_s20, 1  ;;  %p2308_p1 = scmp.eq.s32.totalorder %s2075_s23, 0 }
   0xf   : > { %p296_p2 = scmp.lt.s32.totalorder %s1979_s20, 3  ;;  %s1982_s25 = smov [#allocation8]  }
  0x10   : > { %s344_s26 = sshll.u32 %s1982_s25, 4  ;;  %s1983_s28 = smov [#allocation7]   ;;  %s345_s26 = int_to_ptr.vmem [resolvable:$true] %s344_s26 }
  0x11   : > { %p2080_p3 = pnand %p1415_p0, %p296_p2  ;;  %s330_s29 = sshll.u32 %s1983_s28, 4  ;;  %s2093_s29 = int_to_ptr.vmem [resolvable:$true] %s330_s29 }
  0x12   : > { %s1786_s30 = scalar_lea.vmem %s309_s22, 4096  ;;  %p1794_p11 = scmp.lt.s32.totalorder %s309_s22, %s309_s22 }
  0x13   : > { %s2318_s24 = scalar_select %p2080_p3, 1, 0 }
  0x14   : > { %p1609_p5 = pneg %p2080_p3  ;;  %p1787_p8 = scmp.ne.s32.totalorder %s309_s22, %s1786_s30 }
  0x15   : > { %p1795_p12 = scmp.lt.s32.totalorder %s1786_s30, %s1786_s30 }
  0x16   : > { %p2089_p6 = pnand %p1609_p5, %p2308_p1 }
  0x17   : > { %p1796_p13 = por %p1795_p12, %p1794_p11 }
  0x18   : > { %p1777_p7 = pneg %p2089_p6 }
  0x1a   : > { %p1789_p9 = pnand %p1787_p8, %p1777_p7 }
  0x1c   : > { %p1790_p10 = pneg %p1789_p9 }
  0x1e   : > { %p1797_p0 = pnand %p1796_p13, %p1790_p10 }
  0x20   : > { %1800 = shalt.err (!%p1797_p0)
}
  0x21   : > { %s1984_s12 = smov 64   ;;  %s1985_s13 = smov 4  }
  0x22   : > { %s2320_s1 = sld [smem:[#allocation18_spill]]  ;;  %s1812_s16 = scalar_lea.vmem %s345_s26, 16 }
  0x23   : > { %p1813_p2 = scmp.ne.s32.totalorder %s345_s26, %s1812_s16  ;;  %s1819_s21 = scalar_lea.vmem %s345_s26, 32 }
  0x24   : > { %p1820_p9 = scmp.lt.s32.totalorder %s345_s26, %s345_s26  ;;  %p1821_p11 = scmp.lt.s32.totalorder %s1819_s21, %s1812_s16 }
  0x25   : > { %p1815_p5 = pnand %p1813_p2, %p1777_p7 }
  0x26   : > { %p1822_p10 = por %p1821_p11, %p1820_p9 }
  0x27   : > { %p1816_p8 = pneg %p1815_p5 }
  0x28   : > { %1612 = dma.hbm_to_vmem [thread:$0]  (!%p2089_p6), %s2320_s1, 4096, %s309_s22, [#allocation6], %s1984_s12, %s1984_s12, %s1985_s13  }
  0x29   : > { %p1823_p12 = pnand %p1822_p10, %p1816_p8 }
  0x2b   : > { %1826 = shalt.err (!%p1823_p12)
}
  0x2c   : > { %s2321_s6 = sld [smem:[#allocation20_spill]]  ;;  %s1838_s22 = scalar_lea.vmem %s2093_s29, 1024 }
  0x2d   : > { %p1839_p13 = scmp.ne.s32.totalorder %s2093_s29, %s1838_s22  ;;  %p1846_p5 = scmp.lt.s32.totalorder %s2093_s29, %s2093_s29 }
  0x2e   : > { %p1847_p8 = scmp.lt.s32.totalorder %s1838_s22, %s1838_s22 }
  0x2f   : > { %p1841_p0 = pnand %p1839_p13, %p1777_p7 }
  0x30   : > { %p1848_p9 = por %p1847_p8, %p1846_p5 }
  0x31   : > { %p1842_p2 = pneg %p1841_p0 }
  0x32   : > { %1618 = dma.hbm_to_vmem [thread:$0]  (!%p2089_p6), %s2321_s6, 16, %s345_s26, [#allocation9]  }
  0x33   : > { %p1849_p11 = pnand %p1848_p9, %p1842_p2 }
  0x35   : > { %1852 = shalt.err (!%p1849_p11)
}
  0x36   : > { %s2322_s5 = sld [smem:[#allocation19_spill]]  ;;  %s1986_s26 = smov [#allocation10]  }
  0x37   : > { %s360_s15 = sshll.u32 %s1986_s26, 4  ;;  %s361_s15 = int_to_ptr.vmem [resolvable:$true] %s360_s15 }
  0x38   : > { %s1864_s16 = scalar_lea.vmem %s361_s15, 4096  ;;  %p1872_p0 = scmp.lt.s32.totalorder %s361_s15, %s361_s15 }
  0x39   : > { %p1865_p10 = scmp.ne.s32.totalorder %s361_s15, %s1864_s16  ;;  %p1873_p2 = scmp.lt.s32.totalorder %s1864_s16, %s1864_s16 }
  0x3b   : > { %p1867_p12 = pnand %p1865_p10, %p1777_p7  ;;  %p1874_p5 = por %p1873_p2, %p1872_p0 }
  0x3c   : > { %1615 = dma.hbm_to_vmem [thread:$0]  (!%p2089_p6), %s2322_s5, 1024, %s2093_s29, [#allocation6], %s1984_s12, %s1984_s12, %s1985_s13  }
  0x3d   : > { %p1868_p13 = pneg %p1867_p12 }
  0x3f   : > { %p1875_p8 = pnand %p1874_p5, %p1868_p13 }
  0x41   : > { %1878 = shalt.err (!%p1875_p8)
}
  0x42   : > { %s1987_s21 = smov 256   ;;  %s1988_s29 = smov 16  }
  0x43   : > { %s2323_s9 = sld [smem:[#allocation21_spill]]  ;;  %s1414_s25 = sadd.s32 4294967294, %s1979_s20  }
  0x44   : > { %s2136_s28 = sadd.s32 1, %s1979_s20   ;;  %s36_s30 = sadd.s32 1, %s1975_s19 }
  0x45   : > { %s33_s22 = ssub.s32 %s1979_s20, %s2136_s28  ;;  %p43_p9 = scmp.ne.s32.totalorder %s1975_s19, %s1971_s18 }
  0x46   : > { %p34_p7 = scmp.eq.s32.totalorder %s33_s22, 0  ;;  %p44_p11 = scmp.eq.s32.totalorder %s1979_s20, 0 }
  0x47   : > { %p49_p10 = scmp.ne.s32.totalorder %s1971_s18, %s1967_s17  ;;  %p283_p13 = scmp.eq.s32.totalorder %s2075_s23, 1 }
  0x48   : > { %s2147_s14 = scalar_select %p34_p7, %s1975_s19, %s36_s30  }
  0x49   : > { %1621 = dma.hbm_to_vmem [thread:$0]  (!%p2089_p6), %s2323_s9, 4096, %s361_s15, [#allocation9], %s1987_s21, %s1987_s21, %s1988_s29  }
  0x4a   : > { %2324 = sst [smem:[#allocation17_spill]] %s2147_s14  ;;  %p2149_p12 = por %p44_p11, %p43_p9 }
  0x4b   : > { %p2155_p6 = por %p2308_p1, %p49_p10  ;;  %p289_p0 = scmp.eq.s32.totalorder %s1414_s25, 1 }
  0x4c   : > { %p1634_p2 = scmp.lt.s32.totalorder %s1979_s20, 2  ;;  %s377_s15 = sand.u32 1, %s1975_s19  }
  0x4d   : > { %s2326_s26 = scalar_select %p2155_p6, 1, 0 }
  0x4e   : > { %p2162_p5 = por %p283_p13, %p43_p9  ;;  %p2166_p8 = por %p289_p0, %p49_p10 }
  0x4f   : > { %s1421_s29 = sshll.u32 %s377_s15, 5  ;;  %s1514_s12 = sshll.u32 %s1979_s20, 9 }
  0x50   : > { %s2327_s16 = scalar_select %p2162_p5, 1, 0 }
  0x51   : > { %s2328_s21 = scalar_select %p2166_p8, 1, 0 }
  0x52   : > { %s2174_s30 = scalar_lea.hbm %s2296_s0, %s1514_s12  ;;  %s381_s25 = scalar_lea.vmem [#allocation2], %s1421_s29 }
  0x53   : > { %s389_s1 = sshll.u32 %s381_s25, 4  ;;  %p2178_p7 = pnand %p1634_p2, %p2149_p12  ;;  %s390_s1 = int_to_ptr.vmem [resolvable:$true] %s389_s1 }
  0x54   : > { %s378_s6 = scalar_lea.sflag [#allocation3], %s377_s15  ;;  %s1879_s9 = scalar_lea.hbm %s2174_s30, 512 }
  0x55   : > { %p1880_p9 = scmp.ne.s32.totalorder %s2174_s30, %s1879_s9  ;;  %p1881_p11 = pneg %p2178_p7 }
  0x56   : > { %s1884_s22 = scalar_lea.hbm %s2296_s0, 1024  ;;  %p1885_p0 = scmp.lt.s32.totalorder %s2174_s30, %s2296_s0 }
  0x57   : > { %p1882_p10 = pnand %p1881_p11, %p1880_p9  ;;  %p1886_p12 = scmp.lt.s32.totalorder %s1884_s22, %s1879_s9 }
  0x59   : > { %p1883_p13 = pneg %p1882_p10  ;;  %p1887_p2 = por %p1886_p12, %p1885_p0 }
  0x5b   : > { %p1888_p4 = pnand %p1887_p2, %p1883_p13 }
  0x5d   : > { %1891 = shalt.err (!%p1888_p4)
}
  0x5e   : > { %s1892_s27 = scalar_lea.vmem %s390_s1, 512  ;;  %s1989_s15 = smov [#allocation2]  }
  0x5f   : > { %p1893_p1 = scmp.ne.s32.totalorder %s390_s1, %s1892_s27  ;;  %s1897_s14 = sshll.u32 %s1989_s15, 4  ;;  %s1898_s14 = int_to_ptr.vmem [resolvable:$false] %s1897_s14 }
  0x60   : > { %s1899_s19 = scalar_lea.vmem %s1898_s14, 1024  ;;  %p1900_p9 = scmp.lt.s32.totalorder %s390_s1, %s1898_s14 }
  0x61   : > { %p1895_p8 = pnand %p1893_p1, %p1881_p11  ;;  %p1901_p10 = scmp.lt.s32.totalorder %s1899_s19, %s1892_s27 }
  0x63   : > { %p1896_p5 = pneg %p1895_p8  ;;  %p1902_p6 = por %p1901_p10, %p1900_p9 }
  0x65   : > { %p1903_p3 = pnand %p1902_p6, %p1896_p5 }
  0x67   : > { %1906 = shalt.err (!%p1903_p3)
}
  0x68   : > { %1625 = dma.hbm_to_vmem [thread:$0]  (!%p2178_p7), %s2174_s30, 512, %s390_s1, %s378_s6  }
  0x69   : > { %p2330_p13 = scmp.ne.s32.totalorder %s2318_s24, 0 }
  0x6a   : > { %s2199_s9 = sand.u32 (!%p2330_p13), 1, %s1971_s18   ;;  %p2331_p1 = scmp.ne.s32.totalorder (!%p2330_p13), %s2326_s26, 0 }
  0x6b   : > { %398 = sbr.rel (%p2330_p13) target bundleno = 1109 (0x455), region = 64  ;;  %s1425_s12 = sshll.u32 (!%p2330_p13), %s2199_s9, 5 }
  0x6c   : > { %s401_s14 = scalar_lea.sflag (!%p2330_p13), [#allocation3], %s2199_s9  ;;  %s2205_s19 = scalar_lea.vmem (!%p2330_p13), [#allocation2], %s1425_s12 }
  0x70   : > { %1950 = dma.done.wait (%p2331_p1), %s401_s14, 512  }
  0x71   : > { %1952 = vsyncadd (%p2331_p1), %s401_s14, 4294966784  ;;  %p2332_p3 = scmp.eq.s32.totalorder %s2075_s23, 0 }
  0x73   : > { %1954 = dma.done.wait (%p2332_p3), [#allocation6], 5120   ;;  %p2333_p4 = pmov %p2332_p3 }
  0x74   : > { %p2334_p6 = pmov %p2332_p3 }
  0x75   : > { %1956 = vsyncadd (%p2333_p4), [#allocation6], 4294962176 }
  0x76   : > { %1958 = dma.done.wait (%p2334_p6), [#allocation9], 4112   ;;  %p2335_p5 = pmov %p2332_p3 }
  0x77   : > { %v1683_v0 = vld [vmem:[#allocation5 + $0x78] sm:$0xff]   ;;  %v1687_v4 = vld [vmem:[#allocation5 + $0x70] sm:$0xff]   ;;  %v1691_v8 = vld [vmem:[#allocation5 + $0x68] sm:$0xff]   ;;  %v1990_v56 = vmov 0.0   ;;  %vm1991_vm0 = vmmov 0   ;;  %s1515_s14 = sshll.u32 %s2075_s23, 9 }
  0x78   : > { %1960 = vsyncadd (%p2335_p5), [#allocation9], 4294963184  ;;  %v1684_v1 = vld [vmem:[#allocation5 + $0xf8] sm:$0xff]   ;;  %1516 = vmatprep.subr.bf16.mxu0 %v1683_v0  ;;  %v1688_v5 = vld [vmem:[#allocation5 + $0xf0] sm:$0xff]   ;;  %s2253_s24 = scalar_lea.hbm %s2307_s11, %s1515_s14  ;;  %s1292_s23 = scalar_lea.sflag [#allocation4], %s2199_s9 }
  0x79   : > { %v1685_v2 = vld [vmem:[#allocation5 + $0x38] sm:$0xff]   ;;  %1538 = vmatprep.subr.bf16.mxu1 %v1684_v1  ;;  %v1689_v6 = vld [vmem:[#allocation5 + $0x30] sm:$0xff]   ;;  %v1692_v9 = vld [vmem:[#allocation5 + $0xe8] sm:$0xff]   ;;  %p2336_p7 = scmp.ne.s32.totalorder %s2327_s16, 0  ;;  %s1993_s26 = smov [#allocation11]  }
  0x7a   : > { %v1686_v3 = vld [vmem:[#allocation5 + $0xb8] sm:$0xff]   ;;  %1517 = vmatpush3.bf16.msra.mxu0 %v1685_v2  ;;  %v1690_v7 = vld [vmem:[#allocation5 + $0xb0] sm:$0xff]   ;;  %v1693_v10 = vld [vmem:[#allocation5 + $0x28] sm:$0xff]   ;;  %s1911_s30 = sshll.u32 %s1993_s26, 4  ;;  %s1912_s30 = int_to_ptr.vmem [resolvable:$false] %s1911_s30 }
  0x7b   : > { %1539 = vmatpush3.bf16.msra.mxu1 %v1686_v3  ;;  %1518 = vmatprep.subr.bf16.mxu0 %v1687_v4  ;;  %v1694_v11 = vld [vmem:[#allocation5 + $0xa8] sm:$0xff]   ;;  %v1695_v12 = vld [vmem:[#allocation5 + $0x60] sm:$0xff]   ;;  %v1699_v16 = vld [vmem:[#allocation5 + $0x58] sm:$0xff]   ;;  %s1913_s13 = scalar_lea.vmem %s1912_s30, 1024 }
  0x7c   : > { %1540 = vmatprep.subr.bf16.mxu1 %v1688_v5  ;;  %v1696_v13 = vld [vmem:[#allocation5 + $0xe0] sm:$0xff]   ;;  %v1700_v17 = vld [vmem:[#allocation5 + $0xd8] sm:$0xff]   ;;  %v1703_v20 = vld [vmem:[#allocation5 + $0x50] sm:$0xff]  }
  0x7d   : > { %v1697_v14 = vld [vmem:[#allocation5 + $0x20] sm:$0xff]   ;;  %v1701_v18 = vld [vmem:[#allocation5 + $0x18] sm:$0xff]   ;;  %v1704_v21 = vld [vmem:[#allocation5 + $0xd0] sm:$0xff]  }
  0x7e   : > { %1519 = vmatpush3.bf16.msra.mxu0 %v1689_v6  ;;  %v1698_v15 = vld [vmem:[#allocation5 + $0xa0] sm:$0xff]   ;;  %v1702_v19 = vld [vmem:[#allocation5 + $0x98] sm:$0xff]   ;;  %v1705_v22 = vld [vmem:[#allocation5 + $0x10] sm:$0xff]  }
  0x7f   : > { %1541 = vmatpush3.bf16.msra.mxu1 %v1690_v7  ;;  %1520 = vmatprep.subr.bf16.mxu0 %v1691_v8  ;;  %v1706_v23 = vld [vmem:[#allocation5 + $0x90] sm:$0xff]   ;;  %v1707_v24 = vld [vmem:[#allocation5 + $0x48] sm:$0xff]   ;;  %v1711_v28 = vld [vmem:[#allocation5 + $0x40] sm:$0xff]  }
  0x80   : > { %1542 = vmatprep.subr.bf16.mxu1 %v1692_v9  ;;  %v1708_v25 = vld [vmem:[#allocation5 + $0xc8] sm:$0xff]   ;;  %v1712_v29 = vld [vmem:[#allocation5 + $0xc0] sm:$0xff]   ;;  %v463_v33 = vld [vmem:[%s2205_s19 + $0x18] sm:$0xff] }
  0x81   : > { %v1709_v26 = vld [vmem:[#allocation5 + $0x8] sm:$0xff]   ;;  %v1713_v30 = vld [vmem:[#allocation5] sm:$0xff]   ;;  %v467_v36 = vpack.c.bf16 %v463_v33, %v463_v33  ;;  %v462_v38 = vld [vmem:[%s2205_s19 + $0x10] sm:$0xff] }
  0x82   : > { %1521 = vmatpush3.bf16.msra.mxu0 %v1693_v10  ;;  %v1710_v27 = vld [vmem:[#allocation5 + $0x88] sm:$0xff]   ;;  %v1714_v31 = vld [vmem:[#allocation5 + $0x80] sm:$0xff]   ;;  %v466_v39 = vpack.c.bf16 %v462_v38, %v462_v38  ;;  %v1715_v55 = vld [vmem:[#allocation7 + $0x38] sm:$0xff]  }
  0x83   : > { %1543 = vmatpush3.bf16.msra.mxu1 %v1694_v11  ;;  %1522 = vmatprep.subr.bf16.mxu0 %v1695_v12  ;;  %v461_v32 = vld [vmem:[%s2205_s19 + $0x8] sm:$0xff]  ;;  %v460_v34 = vld [vmem:[%s2205_s19] sm:$0xff]  ;;  %v1716_v57 = vld [vmem:[#allocation7 + $0x30] sm:$0xff]   ;;  %s458_s19 = scalar_lea.vmem [#allocation11], %s1425_s12 }
  0x84   : > { %1544 = vmatprep.subr.bf16.mxu1 %v1696_v13  ;;  %v465_v35 = vpack.c.bf16 %v461_v32, %v461_v32  ;;  %v464_v37 = vpack.c.bf16 %v460_v34, %v460_v34  ;;  %803 = vmatprep.mubr.bf16.mxu1 %v467_v36  ;;  %v1431_v42 = vld [vmem:[%s2298_s2] ss:$0 sm:$0xff]  ;;  %v1717_v58 = vld [vmem:[#allocation7 + $0x28] sm:$0xff]   ;;  %v1719_v60 = vld [vmem:[#allocation7 + $0x18] sm:$0xff]   ;;  %s1306_s1 = sshll.u32 %s458_s19, 4  ;;  %s2255_s1 = int_to_ptr.vmem [resolvable:$true] %s1306_s1 }
  0x85   : > { %v1718_v59 = vld [vmem:[#allocation7 + $0x20] sm:$0xff]   ;;  %v1720_v61 = vld [vmem:[#allocation7 + $0x10] sm:$0xff]   ;;  %v1721_v62 = vld [vmem:[#allocation7 + $0x8] sm:$0xff]   ;;  %s1907_s12 = scalar_lea.vmem %s2255_s1, 512  ;;  %p1914_p12 = scmp.lt.s32.totalorder %s2255_s1, %s1912_s30 }
  0x86   : > { %1523 = vmatpush3.bf16.msra.mxu0 %v1697_v14  ;;  %763 = vmatprep.mubr.bf16.mxu0 %v465_v35  ;;  %v1722_v63 = vld [vmem:[#allocation7] sm:$0xff]   ;;  %v1738_v35 = vld [vmem:[#allocation10 + $0xa8] ss:$16 sps:$4 sm:$0xff]   ;;  %p1908_p8 = scmp.ne.s32.totalorder %s2255_s1, %s1907_s12  ;;  %p1915_p2 = scmp.lt.s32.totalorder %s1913_s13, %s1907_s12 }
  0x87   : > { %1545 = vmatpush3.bf16.msra.mxu1 %v1698_v15  ;;  %1524 = vmatprep.subr.bf16.mxu0 %v1699_v16  ;;  %v1464_v7 = vld [vmem:[%s2299_s3] ss:$0 sm:$0xff]  ;;  %v1737_v32 = vld [vmem:[#allocation10 + $0xa4] ss:$16 sps:$4 sm:$0xff]   ;;  %v1735_v34 = vld [vmem:[#allocation10 + $0xa0] ss:$16 sps:$4 sm:$0xff]  }
  0x88   : > { %1546 = vmatprep.subr.bf16.mxu1 %v1700_v17  ;;  %v1465_v10 = vld [vmem:[%s2300_s4] ss:$0 sm:$0xff]  ;;  %v1743_v36 = vld [vmem:[#allocation10 + $0x84] ss:$16 sps:$4 sm:$0xff]   ;;  %v1744_v38 = vld [vmem:[#allocation10 + $0x88] ss:$16 sps:$4 sm:$0xff]   ;;  %p1909_p11 = pnand %p1908_p8, %p2336_p7  ;;  %p1916_p9 = por %p1915_p2, %p1914_p12 }
  0x89   : > { %v1466_v16 = vld [vmem:[#allocation8] ss:$0 sm:$0xff] }
  0x8a   : > { %1525 = vmatpush3.bf16.msra.mxu0 %v1701_v18  ;;  %v1740_v33 = vld [vmem:[#allocation10 + $0xac] ss:$16 sps:$4 sm:$0xff]   ;;  %p1910_p0 = pneg %p1909_p11 }
  0x8b   : > { %1547 = vmatpush3.bf16.msra.mxu1 %v1702_v19  ;;  %1526 = vmatprep.subr.bf16.mxu0 %v1703_v20 }
  0x8c   : > { %1548 = vmatprep.subr.bf16.mxu1 %v1704_v21  ;;  %p1917_p10 = pnand %p1916_p9, %p1910_p0 }
  0x8e   : > { %1527 = vmatpush3.bf16.msra.mxu0 %v1705_v22 }
  0x8f   : > { %1549 = vmatpush3.bf16.msra.mxu1 %v1706_v23  ;;  %1528 = vmatprep.subr.bf16.mxu0 %v1707_v24  ;;  %v1725_v24 = vld [vmem:[#allocation10 + $0xe4] ss:$16 sps:$4 sm:$0xff]  }
  0x90   : > { %1550 = vmatprep.subr.bf16.mxu1 %v1708_v25  ;;  %v1728_v25 = vld [vmem:[#allocation10 + $0xec] ss:$16 sps:$4 sm:$0xff]  }
  0x92   : > { %1529 = vmatpush3.bf16.msra.mxu0 %v1709_v26  ;;  %v1723_v26 = vld [vmem:[#allocation10 + $0xe0] ss:$16 sps:$4 sm:$0xff]  }
  0x93   : > { %1551 = vmatpush3.bf16.msra.mxu1 %v1710_v27  ;;  %1530 = vmatprep.subr.bf16.mxu0 %v1711_v28  ;;  %v1726_v27 = vld [vmem:[#allocation10 + $0xe8] ss:$16 sps:$4 sm:$0xff]   ;;  %v1731_v28 = vld [vmem:[#allocation10 + $0xc4] ss:$16 sps:$4 sm:$0xff]  }
  0x94   : > { %1552 = vmatprep.subr.bf16.mxu1 %v1712_v29  ;;  %v1734_v29 = vld [vmem:[#allocation10 + $0xcc] ss:$16 sps:$4 sm:$0xff]  }
  0x96   : > { %1531 = vmatpush3.bf16.msra.mxu0 %v1713_v30  ;;  %v1729_v30 = vld [vmem:[#allocation10 + $0xc0] ss:$16 sps:$4 sm:$0xff]  }
  0x97   : > { %1553 = vmatpush3.bf16.msra.mxu1 %v1714_v31  ;;  %1569 = vmatprep.subr.bf16.mxu0 %v1990_v56  ;;  %v1732_v31 = vld [vmem:[#allocation10 + $0xc8] ss:$16 sps:$4 sm:$0xff]  }
  0x98   : > { %1201 = vmatprep.subr.bf16.mxu1 %v1725_v24 }
  0x99   : > { %764 = vmatmul.mubr.bf16.vlgmr.msra.gmra.mxu0 %v464_v37  ;;  %v1741_v37 = vld [vmem:[#allocation10 + $0x80] ss:$16 sps:$4 sm:$0xff]  }
  0x9a   : > { %804 = vmatmul.mubr.bf16.vlgmr.msra.gmra.mxu1 %v466_v39  ;;  %1570 = vmatpush3.bf16.msra.mxu0 %v1715_v55  ;;  %v1746_v39 = vld [vmem:[#allocation10 + $0x8c] ss:$16 sps:$4 sm:$0xff]   ;;  %v1765_v55 = vld [vmem:[#allocation10] ss:$16 sps:$4 sm:$0xff]  }
  0x9b   : > { %1571 = vmatprep.subr.bf16.mxu0 %v1990_v56  ;;  %1585 = vmatprep.mubr.msk.bf16.mxu0 %vm1991_vm0, %v1990_v56 }
  0x9c   : > { %1202 = vmatpush1.bf16.msra.mxu1 %v1723_v26 }
  0x9d   : > { %1203 = vmatprep.subr.bf16.mxu1 %v1731_v28 }
  0x9e   : > { %1572 = vmatpush3.bf16.msra.mxu0 %v1716_v57 }
  0x9f   : > { %1573 = vmatprep.subr.bf16.mxu0 %v1990_v56 }
  0xa0   : > { %1204 = vmatpush1.bf16.msra.mxu1 %v1729_v30 }
  0xa1   : > { %1205 = vmatprep.subr.bf16.mxu1 %v1737_v32 }
  0xa2   : > { %1574 = vmatpush3.bf16.msra.mxu0 %v1717_v58 }
  0xa3   : > { %1575 = vmatprep.subr.bf16.mxu0 %v1990_v56 }
  0xa4   : > { %1206 = vmatpush1.bf16.msra.mxu1 %v1735_v34 }
  0xa5   : > { %1207 = vmatprep.subr.bf16.mxu1 %v1743_v36 }
  0xa6   : > { %1576 = vmatpush3.bf16.msra.mxu0 %v1718_v59 }
  0xa7   : > { %1577 = vmatprep.subr.bf16.mxu0 %v1990_v56 }
  0xa8   : > { %1208 = vmatpush1.bf16.msra.mxu1 %v1741_v37 }
  0xaa   : > { %1578 = vmatpush3.bf16.msra.mxu0 %v1719_v60 }
  0xab   : > { %1579 = vmatprep.subr.bf16.mxu0 %v1990_v56 }
  0xae   : > { %1580 = vmatpush3.bf16.msra.mxu0 %v1720_v61 }
  0xaf   : > { %1581 = vmatprep.subr.bf16.mxu0 %v1990_v56 }
  0xb2   : > { %1582 = vmatpush3.bf16.msra.mxu0 %v1721_v62 }
  0xb3   : > { %1583 = vmatprep.subr.bf16.mxu0 %v1990_v56  ;;  %v1768_v56 = vld [vmem:[#allocation10 + $0x8] ss:$16 sps:$4 sm:$0xff]  }
  0xb6   : > { %1584 = vmatpush3.bf16.msra.mxu0 %v1722_v63 }
  0xb7   : > { %1242 = vmatprep.subr.bf16.mxu0 %v1728_v25 }
 0x159   : > { %v1532_v40 = vpop.f32.mrf.mxu0 }
 0x15a   : > { %v1554_v41 = vpop.f32.mrf.mxu1 }
 0x15b   : > { %v1533_v43 = vpop.f32.mrf.mxu0 }
 0x15c   : > { %v1555_v44 = vpop.f32.mrf.mxu1  ;;  %v1534_v45 = vadd.f32 %v1533_v43, %v1532_v40  ;;  %v1749_v40 = vld [vmem:[#allocation10 + $0x64] ss:$16 sps:$4 sm:$0xff]   ;;  %v1750_v43 = vld [vmem:[#allocation10 + $0x68] ss:$16 sps:$4 sm:$0xff]  }
 0x15d   : > { %v1535_v46 = vpop.f32.mrf.mxu0  ;;  %v1556_v49 = vadd.f32 %v1555_v44, %v1554_v41  ;;  %v1752_v41 = vld [vmem:[#allocation10 + $0x6c] ss:$16 sps:$4 sm:$0xff]   ;;  %1209 = vmatprep.subr.bf16.mxu1 %v1749_v40  ;;  %v1755_v44 = vld [vmem:[#allocation10 + $0x44] ss:$16 sps:$4 sm:$0xff]  }
 0x15e   : > { %v1557_v47 = vpop.f32.mrf.mxu1  ;;  %v766_v48 = vadd.f32 %v1534_v45, %v1431_v42  ;;  %v1747_v42 = vld [vmem:[#allocation10 + $0x60] ss:$16 sps:$4 sm:$0xff]   ;;  %v1758_v45 = vld [vmem:[#allocation10 + $0x4c] ss:$16 sps:$4 sm:$0xff]   ;;  %v1992_v46 = vmov 0  }
 0x15f   : > { %v1536_v50 = vpop.f32.mrf.mxu0  ;;  %1233 = vmatprep.mubr.bf16.mxu1 %v1992_v46  ;;  %1210 = vmatpush1.bf16.msra.mxu1 %v1747_v42  ;;  %v1753_v47 = vld [vmem:[#allocation10 + $0x40] ss:$16 sps:$4 sm:$0xff]  }
 0x160   : > { %v1558_v51 = vpop.f32.mrf.mxu1  ;;  %v806_v52 = vadd.f32 %v1556_v49, %v766_v48  ;;  %v1756_v48 = vld [vmem:[#allocation10 + $0x48] ss:$16 sps:$4 sm:$0xff]   ;;  %1211 = vmatprep.subr.bf16.mxu1 %v1755_v44  ;;  %v1761_v49 = vld [vmem:[#allocation10 + $0x24] ss:$16 sps:$4 sm:$0xff]   ;;  %v1764_v50 = vld [vmem:[#allocation10 + $0x2c] ss:$16 sps:$4 sm:$0xff]  }
 0x161   : > { %v1759_v51 = vld [vmem:[#allocation10 + $0x20] ss:$16 sps:$4 sm:$0xff]  }
 0x162   : > { %v811_v53 = vmax.f32 %v806_v52, 0.0  ;;  %v1762_v52 = vld [vmem:[#allocation10 + $0x28] ss:$16 sps:$4 sm:$0xff]  }
 0x163   : > { %1212 = vmatpush1.bf16.msra.mxu1 %v1753_v47 }
 0x164   : > { %814 = vadd.xlane.f32.xlu0 %v811_v53  ;;  %v818_v54 = vmul.f32 %v811_v53, %v811_v53  ;;  %1213 = vmatprep.subr.bf16.mxu1 %v1761_v49 }
 0x167   : > { %1214 = vmatpush1.bf16.msra.mxu1 %v1759_v51 }
 0x168   : > { %819 = vadd.xlane.f32.xlu0 %v818_v54  ;;  %v1770_v54 = vld [vmem:[#allocation10 + $0xc] ss:$16 sps:$4 sm:$0xff]  }
 0x1ed   : > { %v815_v0 = vpop.xlane.xlu0 %814 }
 0x1ee   : > { %v817_v1 = vmul.f32 0.0078125, %v815_v0  ;;  %v1475_v0 = vld [vmem:[%s2303_s7] ss:$0 sm:$0xff] }
 0x1f0   : > { %v822_v3 = vmul.f32 %v817_v1, %v817_v1 }
 0x1f1   : > { %v820_v2 = vpop.xlane.xlu0 %819 }
 0x1f2   : > { %v821_v4 = vmul.f32 0.0078125, %v820_v2 }
 0x1f4   : > { %v823_v5 = vsub.f32 %v821_v4, %v822_v3  ;;  %v1476_v3 = vld [vmem:[%s2304_s8] ss:$0 sm:$0xff] }
 0x1f6   : > { %v824_v6 = vadd.f32 1e-05, %v823_v5 }
 0x1f8   : > { %1771 = vrsqrt.f32 %v824_v6 }
 0x205   : > { %v1772_v8 = vpop.eup %1771 }
 0x206   : > { %v832_v9 = vmul.f32 %v1772_v8, %v1464_v7 }
 0x208   : > { %v833_v11 = vmul.f32 %v832_v9, %v817_v1  ;;  %v841_v13 = vmul.f32 %v832_v9, %v811_v53  ;;  %v1767_v53 = vld [vmem:[#allocation10 + $0x4] ss:$16 sps:$4 sm:$0xff]   ;;  %v1021_v9 = vlaneseq }
 0x209   : > { %1215 = vmatprep.subr.bf16.mxu1 %v1767_v53 }
 0x20a   : > { %v840_v12 = vsub.f32 %v1465_v10, %v833_v11  ;;  %1216 = vmatpush1.bf16.msra.mxu1 %v1765_v55  ;;  %v1022_v10 = vshrl.u32 %v1021_v9, 7 }
 0x20c   : > { %v842_v14 = vadd.f32 %v841_v13, %v840_v12  ;;  %v1023_v11 = vsub.s32 0, %v1022_v10  ;;  %v1031_v12 = vsub.s32 2, %v1022_v10  ;;  %v1019_v13 = vld [vmem:[%s2306_s10] sm:$0xf] }
 0x20e   : > { %v843_v15 = vpack.c.bf16 %v842_v14, %v842_v14  ;;  %v1027_v14 = vsub.s32 1, %v1022_v10 }
 0x210   : > { %1586 = vmatmul.mubr.bf16.vlgmr.msra.gmra.mxu0 %v843_v15  ;;  %v1035_v15 = vsub.s32 3, %v1022_v10 }
 0x211   : > { %1243 = vmatpush1.bf16.msra.mxu0 %v1726_v27  ;;  %1274 = vmatprep.mubr.bf16.mxu0 %v1992_v46 }
 0x212   : > { %1244 = vmatprep.subr.bf16.mxu0 %v1734_v29 }
 0x215   : > { %1245 = vmatpush1.bf16.msra.mxu0 %v1732_v31 }
 0x216   : > { %1246 = vmatprep.subr.bf16.mxu0 %v1740_v33 }
 0x219   : > { %1247 = vmatpush1.bf16.msra.mxu0 %v1738_v35 }
 0x21a   : > { %1248 = vmatprep.subr.bf16.mxu0 %v1746_v39 }
 0x21d   : > { %1249 = vmatpush1.bf16.msra.mxu0 %v1744_v38 }
 0x21e   : > { %1250 = vmatprep.subr.bf16.mxu0 %v1752_v41 }
 0x221   : > { %1251 = vmatpush1.bf16.msra.mxu0 %v1750_v43 }
 0x222   : > { %1252 = vmatprep.subr.bf16.mxu0 %v1758_v45 }
 0x225   : > { %1253 = vmatpush1.bf16.msra.mxu0 %v1756_v48 }
 0x226   : > { %1254 = vmatprep.subr.bf16.mxu0 %v1764_v50 }
 0x229   : > { %1255 = vmatpush1.bf16.msra.mxu0 %v1762_v52 }
 0x22a   : > { %1256 = vmatprep.subr.bf16.mxu0 %v1770_v54 }
 0x22d   : > { %1257 = vmatpush1.bf16.msra.mxu0 %v1768_v56 }
 0x2d0   : > { %v949_v17 = vpop.f32.mrf.mxu0 }
 0x2d1   : > { %v950_v18 = vadd.f32 %v1466_v16, %v949_v17  ;;  %v1024_v16 = vrot.slane %v1019_v13, %v1023_v11  ;;  %v1032_v17 = vrot.slane %v1019_v13, %v1031_v12 }
 0x2d2   : > { %v1587_v19 = vpop.f32.mrf.mxu0 }
 0x2d3   : > { %v2232_v20 = vmax.f32 %v950_v18, 0.0  ;;  %v1028_v18 = vrot.slane %v1019_v13, %v1027_v14  ;;  %v1036_v19 = vrot.slane %v1019_v13, %v1035_v15 }
 0x2d4   : > { %v952_v21 = vpop.f32.mrf.mxu0 }
 0x2d5   : > { %958 = vadd.xlane.f32.xlu1 %v2232_v20  ;;  %v961_v23 = vmul.f32 %v2232_v20, %v2232_v20 }
 0x2d6   : > { %v1588_v22 = vpop.f32.mrf.mxu0 }
 0x2d9   : > { %962 = vadd.xlane.f32.xlu1 %v961_v23 }
 0x35e   : > { %v959_v57 = vpop.xlane.xlu1 %958 }
 0x35f   : > { %v960_v58 = vmul.f32 0.0078125, %v959_v57 }
 0x361   : > { %v965_v60 = vmul.f32 %v960_v58, %v960_v58 }
 0x362   : > { %v963_v59 = vpop.xlane.xlu1 %962 }
 0x363   : > { %v964_v61 = vmul.f32 0.0078125, %v963_v59 }
 0x365   : > { %v966_v62 = vsub.f32 %v964_v61, %v965_v60 }
 0x367   : > { %v967_v63 = vadd.f32 1e-05, %v966_v62 }
 0x369   : > { %1773 = vrsqrt.f32 %v967_v63 }
 0x376   : > { %v1774_v1 = vpop.eup %1773 }
 0x377   : > { %v975_v2 = vmul.f32 %v1774_v1, %v1475_v0 }
 0x379   : > { %v976_v4 = vmul.f32 %v975_v2, %v960_v58  ;;  %v984_v6 = vmul.f32 %v975_v2, %v2232_v20 }
 0x37b   : > { %v983_v5 = vsub.f32 %v1476_v3, %v976_v4 }
 0x37d   : > { %v985_v7 = vadd.f32 %v984_v6, %v983_v5 }
 0x37f   : > { %v986_v8 = vpack.c.bf16 %v985_v7, %v985_v7 }
 0x381   : > { %1234 = vmatmul.mubr.bf16.vlgmr.msra.gmra.mxu1 %v986_v8  ;;  %1275 = vmatmul.mubr.bf16.vlgmr.msra.gmra.mxu0 %v986_v8 }
 0x441   : > { %v1235_v20 = vpop.f32.mrf.mxu1  ;;  %v1276_v21 = vpop.f32.mrf.mxu0 }
 0x442   : > { %v1236_v22 = vadd.f32 %v1235_v20, %v1024_v16  ;;  %v1277_v23 = vadd.f32 %v1276_v21, %v1032_v17 }
 0x443   : > { %v1237_v24 = vpop.f32.mrf.mxu1  ;;  %v1278_v25 = vpop.f32.mrf.mxu0 }
 0x444   : > { %v1283_v26 = vmax.f32 %v1236_v22, 0.0  ;;  %v1285_v27 = vmax.f32 %v1277_v23, 0.0  ;;  %v1238_v28 = vadd.f32 %v1237_v24, %v1028_v18  ;;  %v1279_v29 = vadd.f32 %v1278_v25, %v1036_v19 }
 0x445   : > { %v1239_v30 = vpop.f32.mrf.mxu1  ;;  %v1280_v31 = vpop.f32.mrf.mxu0 }
 0x446   : > { %1287 = vst [vmem:[%s458_s19] sm:$0xff] %v1283_v26  ;;  %1289 = vst [vmem:[%s458_s19 + $0x10] sm:$0xff] %v1285_v27  ;;  %v1284_v32 = vmax.f32 %v1238_v28, 0.0  ;;  %v1286_v33 = vmax.f32 %v1279_v29, 0.0 }
 0x447   : > { %v1240_v34 = vpop.f32.mrf.mxu1  ;;  %v1281_v35 = vpop.f32.mrf.mxu0 }
 0x448   : > { %1288 = vst [vmem:[%s458_s19 + $0x8] sm:$0xff] %v1284_v32  ;;  %1290 = vst [vmem:[%s458_s19 + $0x18] sm:$0xff] %v1286_v33 }
 0x449   : > { %1920 = shalt.err (!%p1917_p10)
}
 0x44a   : > { %s1921_s22 = scalar_lea.hbm %s2253_s24, 512  ;;  %s1925_s25 = scalar_lea.hbm %s2307_s11, 1024 }
 0x44b   : > { %p1922_p13 = scmp.ne.s32.totalorder %s2253_s24, %s1921_s22  ;;  %p1926_p4 = scmp.lt.s32.totalorder %s2253_s24, %s2307_s11 }
 0x44c   : > { %p1927_p6 = scmp.lt.s32.totalorder %s1925_s25, %s1921_s22 }
 0x44d   : > { %p1923_p1 = pnand %p1922_p13, %p2336_p7 }
 0x44e   : > { %p1928_p5 = por %p1927_p6, %p1926_p4 }
 0x44f   : > { %p1924_p3 = pneg %p1923_p1 }
 0x451   : > { %p1929_p8 = pnand %p1928_p5, %p1924_p3 }
 0x453   : > { %1932 = shalt.err (!%p1929_p8)
}
 0x454   : > { %1607 = dma.vmem_to_hbm [thread:$0]  (%p2336_p7), %s2255_s1, 512, %s2253_s24, %s1292_s23  }
 0x455 PF: > { %s1318_s14 = sand.u32 1, %s1967_s17   ;;  %p2337_p11 = scmp.ne.s32.totalorder %s2328_s21, 0 }
 0x456   : > { %p2338_p0 = scmp.ge.s32.totalorder %s1979_s20, 2  ;;  %s1319_s19 = scalar_lea.sflag [#allocation4], %s1318_s14 }
 0x458   : > { %p1627_p12 = pnand %p2338_p0, %p2337_p11 }
 0x45a   : > { %p1628_p2 = pneg %p1627_p12 }
 0x45c   : > { %1962 = dma.done.wait (%p1628_p2), %s1319_s19, 512  }
 0x45d   : > { %1964 = vsyncadd (%p1628_p2), %s1319_s19, 4294966784  ;;  %s2339_s5 = sld [smem:[#allocation16_spill]]  ;;  %p26_p9 = scmp.ge.s32.totalorder %s2136_s28, 4  }
 0x45e   : > { %s2340_s19 = sld [smem:[#allocation17_spill]]  ;;  %s2341_s17 = smov %s1971_s18 }
 0x45f   : > { %s2343_s20 = smov %s2136_s28  ;;  %28 = sbr.rel (!%p26_p9) target bundleno = 12 (0xc), region = 125 }
 0x463   : > { %s2342_s18 = smov %s2339_s5 }
 0x464   :  { %1324 = vsyncpa [#allocation3], 1 }
 0x465   :  { %1326 = vsyncpa [#allocation3 + $0x1], 1 }
 0x466   :  { %1327 = vsyncpa [#allocation6], 1 }
 0x467   :  { %1328 = vsyncpa [#allocation9], 1 }
 0x468   :  { %1329 = vsyncpa [#allocation4], 1 }
 0x469   :  { %1331 = vsyncpa [#allocation4 + $0x1], 1 }

</bundles_post_ra>
